<compile_context>
chip_gen: v6e
topology: v6e:2x2x1
jax: 0.10.0
libtpu: 0.0.40
codegen_flags: <defaults>
</compile_context>

<pallas_src>
import functools

import jax
import jax.numpy as jnp
import numpy as np
from jax.experimental import pallas as pl
from jax.experimental.pallas import tpu as pltpu


# ----------------------------------------------------------------------------
# One-time hardware calibration of the lane-rotate direction
# ----------------------------------------------------------------------------
@functools.lru_cache(maxsize=None)
def _lane_roll_backshift_sign():
    """Sign g such that pltpu.roll(v, (g*s) % L, axis=1)[:, p] == v[:, (p+s) % L].

    The 3x3-conv tap shift needs exactly this "fetch the value s lanes ahead"
    semantics; the boundary masks zero every lane that wraps around, so one
    roll per tap is sufficient.  This probes the hardware rotate once (the
    review's "verify the roll direction once").  Must be called outside a jit
    trace (it inspects a concrete result); prime it eagerly before jitting
    resblock_pallas (done in __main__) -- afterwards the cached int is used.
    """
    def probe(x_ref, o_ref):
        o_ref[...] = pltpu.roll(x_ref[...], 1, axis=1)

    x = jnp.tile(jnp.arange(128, dtype=jnp.float32)[None, :], (8, 1))
    out = np.asarray(
        pl.pallas_call(probe,
                       out_shape=jax.ShapeDtypeStruct((8, 128), jnp.float32))(x))
    if out[0, 0] == 127.0:    # roll(v, 1)[p] == v[p - 1]  (jnp.roll convention)
        return -1
    if out[0, 0] == 1.0:      # roll(v, 1)[p] == v[p + 1]  (opposite convention)
        return 1
    raise AssertionError(f"unexpected pltpu.roll semantics: {out[0, :4]}")


# ----------------------------------------------------------------------------
# In-kernel building blocks
# ----------------------------------------------------------------------------
def _silu(x):
    return x * (1.0 / (1.0 + jnp.exp(-x)))


def _group_norm(x, pool, gamma, beta, eps):
    """GroupNorm on a (C, HW) tile: lane-reduce first, group-pool second.

    `pool` is a constant (C, C) matrix with pool[c, c'] = 1/channels_per_group
    when c and c' share a group, so pooling the per-channel lane means /
    second moments yields the group statistics broadcast back to every channel
    of the group -- two (C,C)x(C,1) matvecs, no cross-sublane reshapes.
    """
    mean_c = jnp.mean(x, axis=-1, keepdims=True)                       # (C, 1)
    gmean = jnp.dot(pool, mean_c, preferred_element_type=jnp.float32)  # (C, 1)
    d = x - gmean
    var_c = jnp.mean(d * d, axis=-1, keepdims=True)                    # (C, 1)
    gvar = jnp.dot(pool, var_c, preferred_element_type=jnp.float32)    # (C, 1)
    return d * jax.lax.rsqrt(gvar + eps) * gamma + beta


def _conv3x3(h, w_ref, bias, mask_ref, tap_ref, *, W, roll_sign):
    """3x3 same-padding conv on a (Cin, HW) f32 tile as ONE fused MXU matmul.

    w_ref    : (Cout, 9*Cin) bf16 weights; column block t = ky*3 + kx holds
               w[:, :, ky, kx].
    mask_ref : (9, 1, HW) {0,1} masks of taps whose source pixel is in-image.
    tap_ref  : (9*Cin, HW) bf16 VMEM scratch holding the rolled+masked taps.

    Every wrapped lane of the single roll is an out-of-image source pixel and
    is zeroed by mask_ref[t]; the in-range lanes land exactly on h[:, p+s].
    """
    C, HW = h.shape
    for t in range(9):
        dy, dx = t // 3 - 1, t % 3 - 1
        s = dy * W + dx                       # flattened source offset of this tap
        if s == 0:
            tap = h                           # center tap: mask is all ones
        else:
            shifted = pltpu.roll(h, (roll_sign * s) % HW, axis=1)
            tap = shifted * mask_ref[t]       # zero out-of-image / wrapped lanes
        tap_ref[t * C:(t + 1) * C, :] = tap.astype(tap_ref.dtype)
    acc = jnp.dot(w_ref[...], tap_ref[...], preferred_element_type=jnp.float32)
    return acc + bias


def _resblock_kernel(x_ref, emb_ref, pool_ref, mask_ref,
                     g1_ref, bt1_ref, w1_ref, cb1_ref,
                     we_ref, eb_ref,
                     g2_ref, bt2_ref, w2_ref, cb2_ref,
                     o_ref, tap_ref, *, W, eps, roll_sign):
    x = x_ref[0]                                          # (C, HW) float32
    pool = pool_ref[...]

    # ---- in_layers: GroupNorm(32) -> SiLU -> Conv3x3 (+bias) ----
    h = _group_norm(x, pool, g1_ref[...], bt1_ref[...], eps)
    h = _silu(h)
    h = _conv3x3(h, w1_ref, cb1_ref[...], mask_ref, tap_ref,
                 W=W, roll_sign=roll_sign)

    # ---- emb_layers: SiLU -> Linear, broadcast over spatial positions ----
    e = _silu(emb_ref[0])                                 # (E, 1)
    h = h + (jnp.dot(we_ref[...], e, preferred_element_type=jnp.float32)
             + eb_ref[...])

    # ---- out_layers: GroupNorm(32) -> SiLU -> Dropout -> Conv3x3 (+bias) ----
    # TODO(synk): nn.Dropout is treated as identity (eval mode); no RNG dropout here.
    h = _group_norm(h, pool, g2_ref[...], bt2_ref[...], eps)
    h = _silu(h)
    h = _conv3x3(h, w2_ref, cb2_ref[...], mask_ref, tap_ref,
                 W=W, roll_sign=roll_sign)

    # ---- identity skip connection (out_channels == channels) ----
    o_ref[0] = (x + h).astype(o_ref.dtype)


# ----------------------------------------------------------------------------
# Wrapper
# ----------------------------------------------------------------------------
def resblock_pallas(x, emb, params, *, groups=32, eps=1e-5):
    """ResBlock forward.  x: (N, C, H, W) float32, emb: (N, emb_channels)."""
    N, C, H, W = x.shape
    E = emb.shape[-1]
    HW = H * W
    assert C % groups == 0, "GroupNorm(32) requires channels % 32 == 0"
    assert H >= 3 and W >= 3
    cpg = C // groups

    g1, bt1, w1, cb1, we, eb, g2, bt2, w2, cb2 = params

    # Hardware rotate direction (cached; primed outside jit in __main__).
    roll_sign = _lane_roll_backshift_sign()

    # ---- one-time layout / constant prep (host side, data independent) ----
    x_flat = x.reshape(N, C, HW)              # native NCHW -> (N, C, HW): free
    emb_r = emb.reshape(N, E, 1)              # per-image (E, 1) column

    # group-pooling matrix: averages the channels of each GroupNorm group
    pool = jnp.asarray(
        np.kron(np.eye(groups, dtype=np.float32),
                np.full((cpg, cpg), 1.0 / cpg, dtype=np.float32)))

    # per-tap in-image masks for the 3x3 "same" convolutions
    rr, cc = np.divmod(np.arange(HW), W)
    masks = np.zeros((9, 1, HW), np.float32)
    for t in range(9):
        dy, dx = t // 3 - 1, t % 3 - 1
        masks[t, 0] = ((rr + dy >= 0) & (rr + dy < H) &
                       (cc + dx >= 0) & (cc + dx < W)).astype(np.float32)
    masks = jnp.asarray(masks)

    # conv weights (Cout, Cin, 3, 3) -> fused (Cout, 9*Cin) bf16,
    # column block t = ky*3 + kx matches the tap stacking order in the kernel.
    fuse_w = lambda w: jnp.transpose(w, (0, 2, 3, 1)).reshape(C, 9 * C) \
                          .astype(jnp.bfloat16)
    w1_f, w2_f = fuse_w(w1), fuse_w(w2)

    as_col = lambda v: v.reshape(-1, 1)       # per-channel params as (C, 1)

    img_spec = pl.BlockSpec((1, C, HW), lambda n: (n, 0, 0))
    emb_spec = pl.BlockSpec((1, E, 1), lambda n: (n, 0, 0))

    def const(shape):
        return pl.BlockSpec(shape, lambda n: (0,) * len(shape))

    kernel = functools.partial(_resblock_kernel, W=W, eps=eps,
                               roll_sign=roll_sign)

    out = pl.pallas_call(
        kernel,
        out_shape=jax.ShapeDtypeStruct((N, C, HW), x.dtype),
        grid_spec=pltpu.PrefetchScalarGridSpec(
            num_scalar_prefetch=0,
            grid=(N,),
            in_specs=[
                img_spec,                          # x
                emb_spec,                          # emb (E, 1) column
                const((C, C)),                     # group-pooling matrix
                const((9, 1, HW)),                 # conv boundary masks
                const((C, 1)), const((C, 1)),      # GroupNorm 1 gamma / beta
                const((C, 9 * C)), const((C, 1)),  # conv1 fused weight / bias
                const((C, E)), const((C, 1)),      # emb linear weight / bias
                const((C, 1)), const((C, 1)),      # GroupNorm 2 gamma / beta
                const((C, 9 * C)), const((C, 1)),  # conv2 fused weight / bias
            ],
            out_specs=img_spec,
            scratch_shapes=[pltpu.VMEM((9 * C, HW), jnp.bfloat16)],  # tap stack
        ),
        compiler_params=pltpu.CompilerParams(
            dimension_semantics=("parallel",),
            vmem_limit_bytes=32 * 1024 * 1024),
    )(x_flat, emb_r, pool, masks,
      as_col(g1), as_col(bt1), w1_f, as_col(cb1),
      we, as_col(eb),
      as_col(g2), as_col(bt2), w2_f, as_col(cb2))

    return out.reshape(N, C, H, W)


# ----------------------------------------------------------------------------
# Pure-JAX reference (direct transcription of the PyTorch module) for checking
# ----------------------------------------------------------------------------
def _group_norm_ref(x, gamma, beta, groups, eps):
    N, C, H, W = x.shape
    xg = x.reshape(N, groups, -1)
    mean = jnp.mean(xg, axis=-1, keepdims=True)
    var = jnp.var(xg, axis=-1, keepdims=True)
    xn = ((xg - mean) / jnp.sqrt(var + eps)).reshape(N, C, H, W)
    return xn * gamma.reshape(1, C, 1, 1) + beta.reshape(1, C, 1, 1)


def _conv3x3_ref(x, w, b):
    y = jax.lax.conv_general_dilated(
        x, w, window_strides=(1, 1), padding=((1, 1), (1, 1)),
        dimension_numbers=("NCHW", "OIHW", "NCHW"),
        precision=jax.lax.Precision.HIGHEST)
    return y + b.reshape(1, -1, 1, 1)


def resblock_ref(x, emb, params, *, groups=32, eps=1e-5):
    g1, bt1, w1, cb1, we, eb, g2, bt2, w2, cb2 = params
    h = _conv3x3_ref(_silu(_group_norm_ref(x, g1, bt1, groups, eps)), w1, cb1)
    eo = jnp.dot(_silu(emb), we.T, precision=jax.lax.Precision.HIGHEST) + eb
    h = h + eo[:, :, None, None]
    h = _conv3x3_ref(_silu(_group_norm_ref(h, g2, bt2, groups, eps)), w2, cb2)
    return x + h


if __name__ == "__main__":
    N, C, H, W = 2, 64, 16, 16     # channels must be a multiple of the 32 GN groups
    E = 32                         # emb_channels

    key = jax.random.PRNGKey(0)
    ks = jax.random.split(key, 12)

    x = jax.random.normal(ks[0], (N, C, H, W), dtype=jnp.float32)
    emb = jax.random.normal(ks[1], (N, E), dtype=jnp.float32)

    # in_layers: GroupNorm(32, C) -> SiLU -> Conv2d(C, C, 3, padding=1)
    g1 = 1.0 + 0.1 * jax.random.normal(ks[2], (C,), dtype=jnp.float32)
    bt1 = 0.1 * jax.random.normal(ks[3], (C,), dtype=jnp.float32)
    w1 = 0.1 * jax.random.normal(ks[4], (C, C, 3, 3), dtype=jnp.float32)
    cb1 = 0.1 * jax.random.normal(ks[5], (C,), dtype=jnp.float32)
    # emb_layers: SiLU -> Linear(E, C)
    we = 0.1 * jax.random.normal(ks[6], (C, E), dtype=jnp.float32)
    eb = 0.1 * jax.random.normal(ks[7], (C,), dtype=jnp.float32)
    # out_layers: GroupNorm(32, C) -> SiLU -> Dropout -> Conv2d(C, C, 3, padding=1)
    # (zero_module only zero-INITIALIZES the last conv; random values exercise the path)
    g2 = 1.0 + 0.1 * jax.random.normal(ks[8], (C,), dtype=jnp.float32)
    bt2 = 0.1 * jax.random.normal(ks[9], (C,), dtype=jnp.float32)
    w2 = 0.1 * jax.random.normal(ks[10], (C, C, 3, 3), dtype=jnp.float32)
    cb2 = 0.1 * jax.random.normal(ks[11], (C,), dtype=jnp.float32)

    params = (g1, bt1, w1, cb1, we, eb, g2, bt2, w2, cb2)

    # Prime the roll-direction probe OUTSIDE of jit (it inspects concrete data).
    _lane_roll_backshift_sign()

    y = jax.block_until_ready(jax.jit(resblock_pallas)(x, emb, params))
    y_ref = jax.block_until_ready(resblock_ref(x, emb, params))

    assert y.shape == x.shape and y.dtype == x.dtype
    # Tolerance covers bf16 MXU operand rounding in the two fused conv matmuls
    # (K = 9*C accumulation, f32 accumulate) vs. the f32 HIGHEST-precision XLA
    # reference; any semantic bug (wrong tap shift / mask / weight layout)
    # produces O(1) errors.
    np.testing.assert_allclose(np.asarray(y), np.asarray(y_ref),
                               rtol=3e-2, atol=3e-2)
    print("KERNEL_OK")
</pallas_src>

<mosaic_0001>
module attributes {stable_mosaic.version = 11 : i64} {
  func.func @probe(%arg0: memref<8x128xf32, #tpu.memory_space<vmem>>, %arg1: memref<8x128xf32, #tpu.memory_space<vmem>>) attributes {dimension_semantics = [], scalar_prefetch = 0 : i64, scratch_operands = 0 : i64, tpu.core_type = #tpu.core_type<tc>} {
    %c0 = arith.constant 0 : index
    %c0_0 = arith.constant 0 : index
    %0 = vector.load %arg0[%c0, %c0_0] : memref<8x128xf32, #tpu.memory_space<vmem>>, vector<8x128xf32>
    %c1_i32 = arith.constant 1 : i32
    %1 = tpu.dynamic_rotate %0 by %c1_i32 dim 1 : vector<8x128xf32>, i32 -> vector<8x128xf32>
    %c0_1 = arith.constant 0 : index
    %c0_2 = arith.constant 0 : index
    %2 = vector.load %arg1[%c0_1, %c0_2] : memref<8x128xf32, #tpu.memory_space<vmem>>, vector<8x128xf32>
    tpu.vector_store %arg1[%c0_1, %c0_2], %1 {strides = array<i32>} : memref<8x128xf32, #tpu.memory_space<vmem>>, vector<8x128xf32>,
    return
  }
}

</mosaic_0001>

<bundles_post_ra>
// kernel: tpu_custom_call.1
= control target key start
LH: loop header
LB: loop body
LE: loop exit
PB: predicated region body
PF: predicated region fallthrough
CT: control target
= control target key end

     0   :  { %6 = vsyncpa [#allocation3], 0  ;;  %s106_s0 = inlined_call_operand.hbm [shape: f32[8,128], index: 0, kind: input, shape index: {}]   ;;  %s107_s1 = inlined_call_operand.hbm [shape: f32[8,128], index: 1, kind: output, shape index: {}]  }
   0x1   :  { %7 = vsyncpa [#allocation4], 0  ;;  %s87_s6 = smov [#allocation2]  }
   0x2   :  { %s14_s7 = sshll.u32 %s87_s6, 4  ;;  %s15_s7 = int_to_ptr.vmem [resolvable:$true] %s14_s7 }
   0x3   :  { %s51_s8 = scalar_lea.vmem %s15_s7, 128  ;;  %p56_p1 = scmp.lt.s32.totalorder %s15_s7, %s15_s7 }
   0x4   :  { %p52_p0 = scmp.ne.s32.totalorder %s15_s7, %s51_s8  ;;  %p57_p2 = scmp.lt.s32.totalorder %s51_s8, %s51_s8 }
   0x6   :  { %p58_p3 = por %p57_p2, %p56_p1 }
   0x8   :  { %p59_p4 = pnand %p58_p3, %p52_p0 }
   0xa   :  { %62 = shalt.err (!%p59_p4)
}
   0xb   :  { %17 = dma.hbm_to_vmem [thread:$0]  %s106_s0, 128, %s15_s7, [#allocation3]  }
   0xc   :  { %83 = dma.done.wait [#allocation3], 128  }
   0xd   :  { %84 = vsyncadd [#allocation3], 4294967168  ;;  %v21_v0 = vld [vmem:[#allocation2] sm:$0xff]  ;;  %s88_s11 = smov 1   ;;  %s89_s12 = smov [#allocation5]  }
   0xe   :  { %22 = vrot.lane.b32.xlu0 %v21_v0, %s88_s11  ;;  %s31_s13 = sshll.u32 %s89_s12, 4  ;;  %s32_s13 = int_to_ptr.vmem [resolvable:$true] %s31_s13 }
   0xf   :  { %s63_s14 = scalar_lea.vmem %s32_s13, 128  ;;  %p68_p6 = scmp.lt.s32.totalorder %s32_s13, %s32_s13 }
  0x10   :  { %p64_p5 = scmp.ne.s32.totalorder %s32_s13, %s63_s14  ;;  %p69_p7 = scmp.lt.s32.totalorder %s63_s14, %s63_s14 }
  0x12   :  { %p70_p8 = por %p69_p7, %p68_p6 }
  0x14   :  { %p71_p9 = pnand %p70_p8, %p64_p5 }
  0x80   :  { %v23_v1 = vpop.permute.xlu0 %22 }
  0x81   :  { %24 = vst [vmem:[#allocation5] sm:$0xff] %v23_v1 }
  0x82   :  { %74 = shalt.err (!%p71_p9)
}
  0x83   :  { %34 = dma.vmem_to_hbm [thread:$0]  %s32_s13, 128, %s107_s1, [#allocation4]  }
  0x84   :  { %85 = dma.done.wait [#allocation4], 128  }
  0x85   :  { %86 = vsyncadd [#allocation4], 4294967168 }
  0x86   :  { %38 = vsyncpa [#allocation3], 1 }
  0x87   :  { %39 = vsyncpa [#allocation4], 1 }

</bundles_post_ra>
